<compile_context>
chip_gen: v7x
topology: tpu7x:2x2x1
jax: 0.10.0
libtpu: 0.0.40
codegen_flags: <defaults>
</compile_context>

<pallas_src>
import functools

import jax
import jax.numpy as jnp
from jax.experimental import pallas as pl
from jax.experimental.pallas import tpu as pltpu


def _round_up(x, m):
    return (x + m - 1) // m * m


def mlp_kernel(x_ref, m1_ref, m2_ref,
               w1_ref, b1_ref, w2_ref, b2_ref, w3_ref, b3_ref,
               o_ref):
    # x: (TB, Din_pad) bf16; weights bf16; biases/masks f32.
    x = x_ref[...]

    # linear1 + ReLU + dropout1 (mask is {0,1}; 1/(1-p1) folded into w2)
    h1 = jnp.dot(x, w1_ref[...], preferred_element_type=jnp.float32) + b1_ref[...]
    h1 = jnp.maximum(h1, 0.0) * m1_ref[...]

    # linear2 + ReLU + dropout2 (mask is {0,1}; 1/(1-p2) folded into w3)
    h2 = jnp.dot(h1.astype(w2_ref.dtype), w2_ref[...],
                 preferred_element_type=jnp.float32) + b2_ref[...]
    h2 = jnp.maximum(h2, 0.0) * m2_ref[...]

    # linear3 + softmax over the (lane-dense, padded) feature axis.
    logits = jnp.dot(h2.astype(w3_ref.dtype), w3_ref[...],
                     preferred_element_type=jnp.float32) + b3_ref[...]
    logits = logits - jnp.max(logits, axis=-1, keepdims=True)
    e = jnp.exp(logits)
    # TODO(synk): on real TPU use pl.reciprocal(denom, approx=True) (EUP slot);
    # plain divide is kept here for interpret-sandbox compatibility.
    o_ref[...] = e / jnp.sum(e, axis=-1, keepdims=True)


def init_params(key, num_inputs, num_hiddens1, num_hiddens2, num_outputs):
    """All params ~ Normal(0, 0.01), matching nn.init.normal_(param, 0, 0.01).
    Weights stored as (in, out); biases as (1, out) for 2-D TPU layout."""
    ks = jax.random.split(key, 6)
    std = 0.01
    w1 = jax.random.normal(ks[0], (num_inputs, num_hiddens1), jnp.float32) * std
    b1 = jax.random.normal(ks[1], (1, num_hiddens1), jnp.float32) * std
    w2 = jax.random.normal(ks[2], (num_hiddens1, num_hiddens2), jnp.float32) * std
    b2 = jax.random.normal(ks[3], (1, num_hiddens2), jnp.float32) * std
    w3 = jax.random.normal(ks[4], (num_hiddens2, num_outputs), jnp.float32) * std
    b3 = jax.random.normal(ks[5], (1, num_outputs), jnp.float32) * std
    return (w1, b1, w2, b2, w3, b3)


@functools.partial(jax.jit, static_argnames=("p1", "p2", "batch_tile"))
def net_forward(x, params, dropout_key, *, p1=0.2, p2=0.5, batch_tile=256):
    w1, b1, w2, b2, w3, b3 = params
    B = x.shape[0]
    x2 = x.reshape(B, -1).astype(jnp.float32)          # X.view(X.shape[0], -1)
    num_inputs = x2.shape[1]
    num_hiddens1 = w1.shape[1]
    num_hiddens2 = w2.shape[1]
    num_outputs = w3.shape[1]

    # ---- padded / tiled sizes ----------------------------------------------
    TB = min(batch_tile, _round_up(B, 8))               # batch tile (sublane-aligned)
    Bp = _round_up(B, TB)                                # padded batch
    Dip = _round_up(num_inputs, 128)                     # lane-aligned input features
    Dop = _round_up(num_outputs, 128)                    # lane-dense output features
    grid = (pl.cdiv(Bp, TB),)

    # ---- dropout masks (training semantics), scales folded into w2/w3 ------
    k1, k2 = jax.random.split(dropout_key)
    m1 = jax.random.bernoulli(k1, 1.0 - p1, (Bp, num_hiddens1)).astype(jnp.float32)
    m2 = jax.random.bernoulli(k2, 1.0 - p2, (Bp, num_hiddens2)).astype(jnp.float32)

    # ---- pad + cast operands (bf16 MXU inputs, f32 biases) ------------------
    xp = jnp.zeros((Bp, Dip), jnp.bfloat16).at[:B, :num_inputs].set(
        x2.astype(jnp.bfloat16))
    w1p = jnp.zeros((Dip, num_hiddens1), jnp.bfloat16).at[:num_inputs, :].set(
        w1.astype(jnp.bfloat16))
    w2s = (w2 * (1.0 / (1.0 - p1))).astype(jnp.bfloat16)
    w3s = jnp.zeros((num_hiddens2, Dop), jnp.bfloat16).at[:, :num_outputs].set(
        (w3 * (1.0 / (1.0 - p2))).astype(jnp.bfloat16))
    b1f = b1.astype(jnp.float32)
    b2f = b2.astype(jnp.float32)
    # Padded logit lanes get a huge negative bias so softmax zeroes them out.
    b3p = jnp.full((1, Dop), -1e30, jnp.float32).at[:, :num_outputs].set(
        b3.astype(jnp.float32))

    out = pl.pallas_call(
        mlp_kernel,
        out_shape=jax.ShapeDtypeStruct((Bp, Dop), jnp.float32),
        grid=grid,
        in_specs=[
            pl.BlockSpec((TB, Dip), lambda i: (i, 0)),            # x tile
            pl.BlockSpec((TB, num_hiddens1), lambda i: (i, 0)),   # mask1 tile
            pl.BlockSpec((TB, num_hiddens2), lambda i: (i, 0)),   # mask2 tile
            pl.BlockSpec((Dip, num_hiddens1), lambda i: (0, 0)),  # w1 (resident)
            pl.BlockSpec((1, num_hiddens1), lambda i: (0, 0)),    # b1
            pl.BlockSpec((num_hiddens1, num_hiddens2), lambda i: (0, 0)),  # w2
            pl.BlockSpec((1, num_hiddens2), lambda i: (0, 0)),    # b2
            pl.BlockSpec((num_hiddens2, Dop), lambda i: (0, 0)),  # w3
            pl.BlockSpec((1, Dop), lambda i: (0, 0)),             # b3
        ],
        out_specs=pl.BlockSpec((TB, Dop), lambda i: (i, 0)),
        compiler_params=pltpu.CompilerParams(
            dimension_semantics=("parallel",)),
    )(xp, m1, m2, w1p, b1f, w2s, b2f, w3s, b3p)

    return out[:B, :num_outputs]


if __name__ == "__main__":
    # Small shapes consistent with the module: X is NCHW, flattened to num_inputs.
    B, C, H, W = 2, 4, 16, 16
    num_inputs = C * H * W          # 1024
    num_hiddens1 = 256
    num_hiddens2 = 128
    num_outputs = 10

    key = jax.random.PRNGKey(0)
    kx, kp, kd = jax.random.split(key, 3)
    x = jax.random.normal(kx, (B, C, H, W), jnp.float32)
    params = init_params(kp, num_inputs, num_hiddens1, num_hiddens2, num_outputs)

    probs = net_forward(x, params, kd)
    probs = jax.block_until_ready(probs)

    assert probs.shape == (B, num_outputs)
    assert bool(jnp.all(jnp.isfinite(probs)))
    assert bool(jnp.all(probs >= 0.0))
    # Softmax rows must sum to 1.
    assert bool(jnp.allclose(jnp.sum(probs, axis=1), 1.0, atol=1e-5))
    print("KERNEL_OK")
</pallas_src>

<mosaic_0001>
module attributes {stable_mosaic.version = 11 : i64} {
  func.func @mlp_kernel(%arg0: i32, %arg1: memref<8x1024xbf16, #tpu.memory_space<vmem>>, %arg2: memref<8x256xf32, #tpu.memory_space<vmem>>, %arg3: memref<8x128xf32, #tpu.memory_space<vmem>>, %arg4: memref<1024x256xbf16, #tpu.memory_space<vmem>>, %arg5: memref<1x256xf32, #tpu.memory_space<vmem>>, %arg6: memref<256x128xbf16, #tpu.memory_space<vmem>>, %arg7: memref<1x128xf32, #tpu.memory_space<vmem>>, %arg8: memref<128x128xbf16, #tpu.memory_space<vmem>>, %arg9: memref<1x128xf32, #tpu.memory_space<vmem>>, %arg10: memref<8x128xf32, #tpu.memory_space<vmem>>) attributes {dimension_semantics = [#tpu.dimension_semantics<parallel>], iteration_bounds = array<i64: 1>, scalar_prefetch = 0 : i64, scratch_operands = 0 : i64, tpu.core_type = #tpu.core_type<tc>, window_params = [{transform_indices = @transform_0, window_bounds = array<i64: 8, 1024>}, {transform_indices = @transform_1, window_bounds = array<i64: 8, 256>}, {transform_indices = @transform_2, window_bounds = array<i64: 8, 128>}, {pipeline_mode = #tpu.pipeline_mode<synchronous>, transform_indices = @transform_3, window_bounds = array<i64: 1024, 256>}, {pipeline_mode = #tpu.pipeline_mode<synchronous>, transform_indices = @transform_4, window_bounds = array<i64: 1, 256>}, {pipeline_mode = #tpu.pipeline_mode<synchronous>, transform_indices = @transform_5, window_bounds = array<i64: 256, 128>}, {pipeline_mode = #tpu.pipeline_mode<synchronous>, transform_indices = @transform_6, window_bounds = array<i64: 1, 128>}, {pipeline_mode = #tpu.pipeline_mode<synchronous>, transform_indices = @transform_7, window_bounds = array<i64: 128, 128>}, {pipeline_mode = #tpu.pipeline_mode<synchronous>, transform_indices = @transform_8, window_bounds = array<i64: 1, 128>}, {transform_indices = @transform_9, window_bounds = array<i64: 8, 128>}]} {
    %c0 = arith.constant 0 : index
    %c0_0 = arith.constant 0 : index
    %0 = vector.load %arg1[%c0, %c0_0] : memref<8x1024xbf16, #tpu.memory_space<vmem>>, vector<8x1024xbf16>
    %c0_1 = arith.constant 0 : index
    %c0_2 = arith.constant 0 : index
    %1 = vector.load %arg4[%c0_1, %c0_2] : memref<1024x256xbf16, #tpu.memory_space<vmem>>, vector<1024x256xbf16>
    %cst = arith.constant dense<0.000000e+00> : vector<8x256xf32>
    %2 = tpu.matmul %0, %1, %cst {dimension_numbers = #tpu.dot_dimension_numbers<[1], [0], [0], [1], [0, 0, 1, 1], [], []>} : vector<8x1024xbf16>, vector<1024x256xbf16>, vector<8x256xf32> -> vector<8x256xf32>
    %c0_3 = arith.constant 0 : index
    %c0_4 = arith.constant 0 : index
    %3 = vector.load %arg5[%c0_3, %c0_4] : memref<1x256xf32, #tpu.memory_space<vmem>>, vector<1x256xf32>
    %4 = vector.broadcast %3 : vector<1x256xf32> to vector<8x256xf32>
    %5 = arith.addf %2, %4 : vector<8x256xf32>
    %cst_5 = arith.constant 0.000000e+00 : f32
    %6 = vector.broadcast %cst_5 : f32 to vector<8x256xf32>
    %7 = arith.maximumf %5, %6 : vector<8x256xf32>
    %c0_6 = arith.constant 0 : index
    %c0_7 = arith.constant 0 : index
    %8 = vector.load %arg2[%c0_6, %c0_7] : memref<8x256xf32, #tpu.memory_space<vmem>>, vector<8x256xf32>
    %9 = arith.mulf %7, %8 : vector<8x256xf32>
    %10 = arith.truncf %9 : vector<8x256xf32> to vector<8x256xbf16>
    %c0_8 = arith.constant 0 : index
    %c0_9 = arith.constant 0 : index
    %11 = vector.load %arg6[%c0_8, %c0_9] : memref<256x128xbf16, #tpu.memory_space<vmem>>, vector<256x128xbf16>
    %cst_10 = arith.constant dense<0.000000e+00> : vector<8x128xf32>
    %12 = tpu.matmul %10, %11, %cst_10 {dimension_numbers = #tpu.dot_dimension_numbers<[1], [0], [0], [1], [0, 0, 1, 1], [], []>} : vector<8x256xbf16>, vector<256x128xbf16>, vector<8x128xf32> -> vector<8x128xf32>
    %c0_11 = arith.constant 0 : index
    %c0_12 = arith.constant 0 : index
    %13 = vector.load %arg7[%c0_11, %c0_12] : memref<1x128xf32, #tpu.memory_space<vmem>>, vector<1x128xf32>
    %14 = vector.broadcast %13 : vector<1x128xf32> to vector<8x128xf32>
    %15 = arith.addf %12, %14 : vector<8x128xf32>
    %cst_13 = arith.constant 0.000000e+00 : f32
    %16 = vector.broadcast %cst_13 : f32 to vector<8x128xf32>
    %17 = arith.maximumf %15, %16 : vector<8x128xf32>
    %c0_14 = arith.constant 0 : index
    %c0_15 = arith.constant 0 : index
    %18 = vector.load %arg3[%c0_14, %c0_15] : memref<8x128xf32, #tpu.memory_space<vmem>>, vector<8x128xf32>
    %19 = arith.mulf %17, %18 : vector<8x128xf32>
    %20 = arith.truncf %19 : vector<8x128xf32> to vector<8x128xbf16>
    %c0_16 = arith.constant 0 : index
    %c0_17 = arith.constant 0 : index
    %21 = vector.load %arg8[%c0_16, %c0_17] : memref<128x128xbf16, #tpu.memory_space<vmem>>, vector<128x128xbf16>
    %cst_18 = arith.constant dense<0.000000e+00> : vector<8x128xf32>
    %22 = tpu.matmul %20, %21, %cst_18 {dimension_numbers = #tpu.dot_dimension_numbers<[1], [0], [0], [1], [0, 0, 1, 1], [], []>} : vector<8x128xbf16>, vector<128x128xbf16>, vector<8x128xf32> -> vector<8x128xf32>
    %c0_19 = arith.constant 0 : index
    %c0_20 = arith.constant 0 : index
    %23 = vector.load %arg9[%c0_19, %c0_20] : memref<1x128xf32, #tpu.memory_space<vmem>>, vector<1x128xf32>
    %24 = vector.broadcast %23 : vector<1x128xf32> to vector<8x128xf32>
    %25 = arith.addf %22, %24 : vector<8x128xf32>
    %cst_21 = arith.constant dense<0xFF800000> : vector<8xf32>
    %26 = vector.multi_reduction <maximumf>, %25, %cst_21 [1] : vector<8x128xf32> to vector<8xf32>
    %27 = vector.shape_cast %26 : vector<8xf32> to vector<8x1xf32>
    %28 = vector.broadcast %27 : vector<8x1xf32> to vector<8x128xf32>
    %29 = arith.subf %25, %28 : vector<8x128xf32>
    %30 = math.exp %29 : vector<8x128xf32>
    %cst_22 = arith.constant dense<0.000000e+00> : vector<8xf32>
    %31 = vector.multi_reduction <add>, %30, %cst_22 [1] : vector<8x128xf32> to vector<8xf32>
    %32 = vector.shape_cast %31 : vector<8xf32> to vector<8x1xf32>
    %33 = vector.broadcast %32 : vector<8x1xf32> to vector<8x128xf32>
    %34 = arith.divf %30, %33 : vector<8x128xf32>
    %c0_23 = arith.constant 0 : index
    %c0_24 = arith.constant 0 : index
    %35 = vector.load %arg10[%c0_23, %c0_24] : memref<8x128xf32, #tpu.memory_space<vmem>>, vector<8x128xf32>
    tpu.vector_store %arg10[%c0_23, %c0_24], %34 {strides = array<i32>} : memref<8x128xf32, #tpu.memory_space<vmem>>, vector<8x128xf32>,
    return
  }
  func.func @transform_0(%arg0: i32) -> (i32, i32) {
    %c0_i32 = arith.constant 0 : i32
    %c0_i32_0 = arith.constant 0 : i32
    return %arg0, %c0_i32 : i32, i32
  }
  func.func @transform_1(%arg0: i32) -> (i32, i32) {
    %c0_i32 = arith.constant 0 : i32
    %c0_i32_0 = arith.constant 0 : i32
    return %arg0, %c0_i32 : i32, i32
  }
  func.func @transform_2(%arg0: i32) -> (i32, i32) {
    %c0_i32 = arith.constant 0 : i32
    %c0_i32_0 = arith.constant 0 : i32
    return %arg0, %c0_i32 : i32, i32
  }
  func.func @transform_3(%arg0: i32) -> (i32, i32) {
    %c0_i32 = arith.constant 0 : i32
    %c0_i32_0 = arith.constant 0 : i32
    %c0_i32_1 = arith.constant 0 : i32
    return %c0_i32, %c0_i32_0 : i32, i32
  }
  func.func @transform_4(%arg0: i32) -> (i32, i32) {
    %c0_i32 = arith.constant 0 : i32
    %c0_i32_0 = arith.constant 0 : i32
    %c0_i32_1 = arith.constant 0 : i32
    return %c0_i32, %c0_i32_0 : i32, i32
  }
  func.func @transform_5(%arg0: i32) -> (i32, i32) {
    %c0_i32 = arith.constant 0 : i32
    %c0_i32_0 = arith.constant 0 : i32
    %c0_i32_1 = arith.constant 0 : i32
    return %c0_i32, %c0_i32_0 : i32, i32
  }
  func.func @transform_6(%arg0: i32) -> (i32, i32) {
    %c0_i32 = arith.constant 0 : i32
    %c0_i32_0 = arith.constant 0 : i32
    %c0_i32_1 = arith.constant 0 : i32
    return %c0_i32, %c0_i32_0 : i32, i32
  }
  func.func @transform_7(%arg0: i32) -> (i32, i32) {
    %c0_i32 = arith.constant 0 : i32
    %c0_i32_0 = arith.constant 0 : i32
    %c0_i32_1 = arith.constant 0 : i32
    return %c0_i32, %c0_i32_0 : i32, i32
  }
  func.func @transform_8(%arg0: i32) -> (i32, i32) {
    %c0_i32 = arith.constant 0 : i32
    %c0_i32_0 = arith.constant 0 : i32
    %c0_i32_1 = arith.constant 0 : i32
    return %c0_i32, %c0_i32_0 : i32, i32
  }
  func.func @transform_9(%arg0: i32) -> (i32, i32) {
    %c0_i32 = arith.constant 0 : i32
    %c0_i32_0 = arith.constant 0 : i32
    return %arg0, %c0_i32 : i32, i32
  }
}

</mosaic_0001>

<bundles_post_ra>
// kernel: net_forward.3
= control target key start
LH: loop header
LB: loop body
LE: loop exit
PB: predicated region body
PF: predicated region fallthrough
CT: control target
= control target key end

     0   :  { %vm1777_vm0 = vmmov 0   ;;  %s2335_s3 = inlined_call_operand.vmem [shape: bf16[1024,256], index: 3, kind: input, shape index: {}]   ;;  %s2336_s0 = inlined_call_operand.vmem [shape: bf16[8,1024], index: 0, kind: input, shape index: {}]   ;;  %s2337_s5 = inlined_call_operand.vmem [shape: bf16[256,128], index: 5, kind: input, shape index: {}]   ;;  %s2338_s7 = inlined_call_operand.vmem [shape: bf16[128,128], index: 7, kind: input, shape index: {}]   ;;  %s2339_s4 = inlined_call_operand.vmem [shape: f32[1,256], index: 4, kind: input, shape index: {}]   ;;  %s2340_s1 = inlined_call_operand.vmem [shape: f32[8,256], index: 1, kind: input, shape index: {}]   ;;  %s2341_s6 = inlined_call_operand.vmem [shape: f32[1,128], index: 6, kind: input, shape index: {}]   ;;  %s2342_s2 = inlined_call_operand.vmem [shape: f32[8,128], index: 2, kind: input, shape index: {}]   ;;  %s2343_s8 = inlined_call_operand.vmem [shape: f32[1,128], index: 8, kind: input, shape index: {}]   ;;  %s2344_s9 = inlined_call_operand.vmem [shape: f32[8,128], index: 9, kind: output, shape index: {}]  }
   0x1   :  { %v1548_v0 = vld [vmem:[%s2335_s3 + $0x104] ss:$8 sps:$4 sm:$0xff]   ;;  %v1550_v1 = vld [vmem:[%s2335_s3 + $0x100] ss:$8 sps:$4 sm:$0xff]   ;;  %v1551_v2 = vld [vmem:[%s2335_s3 + $0x114] ss:$8 sps:$4 sm:$0xff]  }
   0x2   :  { %886 = vmatprep.subr.bf16.mxu0 %v1548_v0  ;;  %v1553_v3 = vld [vmem:[%s2335_s3 + $0x110] ss:$8 sps:$4 sm:$0xff]   ;;  %v1554_v4 = vld [vmem:[%s2335_s3 + $0x124] ss:$8 sps:$4 sm:$0xff]   ;;  %v1556_v5 = vld [vmem:[%s2335_s3 + $0x120] ss:$8 sps:$4 sm:$0xff]  }
   0x3   :  { %887 = vmatpush1.bf16.msra.mxu0 %v1550_v1  ;;  %v1557_v6 = vld [vmem:[%s2335_s3 + $0x134] ss:$8 sps:$4 sm:$0xff]   ;;  %v1559_v7 = vld [vmem:[%s2335_s3 + $0x130] ss:$8 sps:$4 sm:$0xff]   ;;  %v1560_v8 = vld [vmem:[%s2335_s3 + $0x144] ss:$8 sps:$4 sm:$0xff]  }
   0x4   :  { %888 = vmatprep.subr.bf16.mxu0 %v1551_v2  ;;  %v1562_v9 = vld [vmem:[%s2335_s3 + $0x140] ss:$8 sps:$4 sm:$0xff]   ;;  %v1563_v10 = vld [vmem:[%s2335_s3 + $0x154] ss:$8 sps:$4 sm:$0xff]   ;;  %v1565_v11 = vld [vmem:[%s2335_s3 + $0x150] ss:$8 sps:$4 sm:$0xff]  }
   0x5   :  { %v1566_v12 = vld [vmem:[%s2335_s3 + $0x164] ss:$8 sps:$4 sm:$0xff]   ;;  %v1568_v15 = vld [vmem:[%s2335_s3 + $0x160] ss:$8 sps:$4 sm:$0xff]   ;;  %v1569_v16 = vld [vmem:[%s2335_s3 + $0x174] ss:$8 sps:$4 sm:$0xff]  }
   0x6   :  { %v1870_v13 = vld [vmem:[%s2336_s0 + $0x8] sm:$0xff]  ;;  %v1571_v17 = vld [vmem:[%s2335_s3 + $0x170] ss:$8 sps:$4 sm:$0xff]   ;;  %v1575_v20 = vld [vmem:[%s2335_s3 + $0x194] ss:$8 sps:$4 sm:$0xff]  }
   0x7   :  { %889 = vmatpush1.bf16.msra.mxu0 %v1553_v3  ;;  %v1324_v14 = vcombine.high %v1870_v13, %v1870_v13  ;;  %v1572_v18 = vld [vmem:[%s2335_s3 + $0x184] ss:$8 sps:$4 sm:$0xff]   ;;  %v1574_v19 = vld [vmem:[%s2335_s3 + $0x180] ss:$8 sps:$4 sm:$0xff]   ;;  %v1577_v21 = vld [vmem:[%s2335_s3 + $0x190] ss:$8 sps:$4 sm:$0xff]   ;;  %v1323_v48 = vcombine.low %v1870_v13, %v1870_v13 }
   0x8   :  { %890 = vmatprep.subr.bf16.mxu0 %v1554_v4  ;;  %v1578_v22 = vld [vmem:[%s2335_s3 + $0x1a4] ss:$8 sps:$4 sm:$0xff]   ;;  %v1580_v23 = vld [vmem:[%s2335_s3 + $0x1a0] ss:$8 sps:$4 sm:$0xff]   ;;  %v1581_v24 = vld [vmem:[%s2335_s3 + $0x1b4] ss:$8 sps:$4 sm:$0xff]  }
   0x9   :  { %918 = vmatprep.mubr.bf16.mxu0 %v1324_v14  ;;  %v1643_v25 = vld [vmem:[%s2335_s3 + $0x4] ss:$8 sps:$4 sm:$0xff]   ;;  %v1645_v26 = vld [vmem:[%s2335_s3] ss:$8 sps:$4 sm:$0xff]   ;;  %v1583_v27 = vld [vmem:[%s2335_s3 + $0x1b0] ss:$8 sps:$4 sm:$0xff]  }
   0xa   :  { %v1584_v28 = vld [vmem:[%s2335_s3 + $0x1c4] ss:$8 sps:$4 sm:$0xff]   ;;  %845 = vmatprep.subr.bf16.mxu1 %v1643_v25  ;;  %v1649_v29 = vld [vmem:[%s2335_s3 + $0x14] ss:$8 sps:$4 sm:$0xff]   ;;  %v1651_v30 = vld [vmem:[%s2335_s3 + $0x10] ss:$8 sps:$4 sm:$0xff]  }
   0xb   :  { %891 = vmatpush1.bf16.msra.mxu0 %v1556_v5  ;;  %846 = vmatpush1.bf16.msra.mxu1 %v1645_v26  ;;  %v1586_v31 = vld [vmem:[%s2335_s3 + $0x1c0] ss:$8 sps:$4 sm:$0xff]   ;;  %v1587_v32 = vld [vmem:[%s2335_s3 + $0x1d4] ss:$8 sps:$4 sm:$0xff]   ;;  %v1657_v33 = vld [vmem:[%s2335_s3 + $0x24] ss:$8 sps:$4 sm:$0xff]  }
   0xc   :  { %892 = vmatprep.subr.bf16.mxu0 %v1557_v6  ;;  %847 = vmatprep.subr.bf16.mxu1 %v1649_v29  ;;  %v1659_v34 = vld [vmem:[%s2335_s3 + $0x20] ss:$8 sps:$4 sm:$0xff]   ;;  %v1663_v35 = vld [vmem:[%s2335_s3 + $0x34] ss:$8 sps:$4 sm:$0xff]   ;;  %v1589_v36 = vld [vmem:[%s2335_s3 + $0x1d0] ss:$8 sps:$4 sm:$0xff]  }
   0xd   :  { %v1590_v37 = vld [vmem:[%s2335_s3 + $0x1e4] ss:$8 sps:$4 sm:$0xff]   ;;  %v1665_v38 = vld [vmem:[%s2335_s3 + $0x30] ss:$8 sps:$4 sm:$0xff]   ;;  %v1592_v40 = vld [vmem:[%s2335_s3 + $0x1e0] ss:$8 sps:$4 sm:$0xff]  }
   0xe   :  { %v1669_v39 = vld [vmem:[%s2335_s3 + $0x44] ss:$8 sps:$4 sm:$0xff]   ;;  %v1593_v41 = vld [vmem:[%s2335_s3 + $0x1f4] ss:$8 sps:$4 sm:$0xff]   ;;  %v1671_v42 = vld [vmem:[%s2335_s3 + $0x40] ss:$8 sps:$4 sm:$0xff]  }
   0xf   :  { %893 = vmatpush1.bf16.msra.mxu0 %v1559_v7  ;;  %848 = vmatpush1.bf16.msra.mxu1 %v1651_v30  ;;  %v1675_v43 = vld [vmem:[%s2335_s3 + $0x54] ss:$8 sps:$4 sm:$0xff]   ;;  %v1595_v44 = vld [vmem:[%s2335_s3 + $0x1f0] ss:$8 sps:$4 sm:$0xff]   ;;  %v1600_v45 = vld [vmem:[%s2335_s3 + $0x204] ss:$8 sps:$4 sm:$0xff]  }
  0x10   :  { %894 = vmatprep.subr.bf16.mxu0 %v1560_v8  ;;  %849 = vmatprep.subr.bf16.mxu1 %v1657_v33  ;;  %v1970_v46 = vld [vmem:[%s2336_s0 + $0x10] sm:$0xff]  ;;  %v1681_v49 = vld [vmem:[%s2335_s3 + $0x64] ss:$8 sps:$4 sm:$0xff]   ;;  %v1598_v50 = vld [vmem:[%s2335_s3 + $0x200] ss:$8 sps:$4 sm:$0xff]  }
  0x11   :  { %v1677_v47 = vld [vmem:[%s2335_s3 + $0x50] ss:$8 sps:$4 sm:$0xff]   ;;  %v1326_v51 = vcombine.high %v1970_v46, %v1970_v46  ;;  %v1603_v52 = vld [vmem:[%s2335_s3 + $0x214] ss:$8 sps:$4 sm:$0xff]   ;;  %v1683_v53 = vld [vmem:[%s2335_s3 + $0x60] ss:$8 sps:$4 sm:$0xff]  }
  0x12   :  { %v1687_v54 = vld [vmem:[%s2335_s3 + $0x74] ss:$8 sps:$4 sm:$0xff]   ;;  %v1601_v55 = vld [vmem:[%s2335_s3 + $0x210] ss:$8 sps:$4 sm:$0xff]   ;;  %v1606_v56 = vld [vmem:[%s2335_s3 + $0x224] ss:$8 sps:$4 sm:$0xff]  }
  0x13   :  { %895 = vmatpush1.bf16.msra.mxu0 %v1562_v9  ;;  %850 = vmatpush1.bf16.msra.mxu1 %v1659_v34  ;;  %v1689_v57 = vld [vmem:[%s2335_s3 + $0x70] ss:$8 sps:$4 sm:$0xff]   ;;  %v1693_v58 = vld [vmem:[%s2335_s3 + $0x84] ss:$8 sps:$4 sm:$0xff]   ;;  %v1604_v59 = vld [vmem:[%s2335_s3 + $0x220] ss:$8 sps:$4 sm:$0xff]  }
  0x14   :  { %896 = vmatprep.subr.bf16.mxu0 %v1563_v10  ;;  %851 = vmatprep.subr.bf16.mxu1 %v1663_v35  ;;  %v1609_v60 = vld [vmem:[%s2335_s3 + $0x234] ss:$8 sps:$4 sm:$0xff]   ;;  %v1695_v61 = vld [vmem:[%s2335_s3 + $0x80] ss:$8 sps:$4 sm:$0xff]   ;;  %v1607_v63 = vld [vmem:[%s2335_s3 + $0x230] ss:$8 sps:$4 sm:$0xff]  }
  0x15   :  { %v1699_v62 = vld [vmem:[%s2335_s3 + $0x94] ss:$8 sps:$4 sm:$0xff]   ;;  %v1612_v0 = vld [vmem:[%s2335_s3 + $0x244] ss:$8 sps:$4 sm:$0xff]   ;;  %v1701_v1 = vld [vmem:[%s2335_s3 + $0x90] ss:$8 sps:$4 sm:$0xff]  }
  0x16   :  { %v1705_v2 = vld [vmem:[%s2335_s3 + $0xa4] ss:$8 sps:$4 sm:$0xff]   ;;  %v1610_v3 = vld [vmem:[%s2335_s3 + $0x240] ss:$8 sps:$4 sm:$0xff]   ;;  %v1615_v4 = vld [vmem:[%s2335_s3 + $0x254] ss:$8 sps:$4 sm:$0xff]  }
  0x17   :  { %897 = vmatpush1.bf16.msra.mxu0 %v1565_v11  ;;  %852 = vmatpush1.bf16.msra.mxu1 %v1665_v38  ;;  %v1707_v5 = vld [vmem:[%s2335_s3 + $0xa0] ss:$8 sps:$4 sm:$0xff]   ;;  %v1711_v6 = vld [vmem:[%s2335_s3 + $0xb4] ss:$8 sps:$4 sm:$0xff]   ;;  %v1613_v7 = vld [vmem:[%s2335_s3 + $0x250] ss:$8 sps:$4 sm:$0xff]  }
  0x18   :  { %898 = vmatprep.subr.bf16.mxu0 %v1566_v12  ;;  %853 = vmatprep.subr.bf16.mxu1 %v1669_v39  ;;  %v1618_v8 = vld [vmem:[%s2335_s3 + $0x264] ss:$8 sps:$4 sm:$0xff]   ;;  %v1713_v10 = vld [vmem:[%s2335_s3 + $0xb0] ss:$8 sps:$4 sm:$0xff]   ;;  %v1616_v13 = vld [vmem:[%s2335_s3 + $0x260] ss:$8 sps:$4 sm:$0xff]  }
  0x19   :  { %v33_v9 = vld [vmem:[%s2336_s0] sm:$0xff]  ;;  %v1621_v14 = vld [vmem:[%s2335_s3 + $0x274] ss:$8 sps:$4 sm:$0xff]   ;;  %v1625_v25 = vld [vmem:[%s2335_s3 + $0x290] ss:$8 sps:$4 sm:$0xff]  }
  0x1a   :  { %v1322_v11 = vcombine.high %v33_v9, %v33_v9  ;;  %v1717_v12 = vld [vmem:[%s2335_s3 + $0xc4] ss:$8 sps:$4 sm:$0xff]   ;;  %v1628_v29 = vld [vmem:[%s2335_s3 + $0x2a0] ss:$8 sps:$4 sm:$0xff]   ;;  %v1633_v30 = vld [vmem:[%s2335_s3 + $0x2b4] ss:$8 sps:$4 sm:$0xff]  }
  0x1b   :  { %899 = vmatpush1.bf16.msra.mxu0 %v1568_v15  ;;  %854 = vmatpush1.bf16.msra.mxu1 %v1671_v42  ;;  %v1719_v15 = vld [vmem:[%s2335_s3 + $0xc0] ss:$8 sps:$4 sm:$0xff]   ;;  %v1630_v26 = vld [vmem:[%s2335_s3 + $0x2a4] ss:$8 sps:$4 sm:$0xff]   ;;  %v1631_v34 = vld [vmem:[%s2335_s3 + $0x2b0] ss:$8 sps:$4 sm:$0xff]  }
  0x1c   :  { %900 = vmatprep.subr.bf16.mxu0 %v1569_v16  ;;  %855 = vmatprep.subr.bf16.mxu1 %v1675_v43  ;;  %v1723_v16 = vld [vmem:[%s2335_s3 + $0xd4] ss:$8 sps:$4 sm:$0xff]   ;;  %v1750_v33 = vld [vmem:[%s2337_s5 + $0x48] sm:$0xff]   ;;  %v1637_v42 = vld [vmem:[%s2335_s3 + $0x2d0] ss:$8 sps:$4 sm:$0xff]  }
  0x1d   :  { %877 = vmatprep.mubr.bf16.mxu1 %v1322_v11  ;;  %v1636_v35 = vld [vmem:[%s2335_s3 + $0x2c4] ss:$8 sps:$4 sm:$0xff]   ;;  %v1634_v38 = vld [vmem:[%s2335_s3 + $0x2c0] ss:$8 sps:$4 sm:$0xff]   ;;  %v1639_v39 = vld [vmem:[%s2335_s3 + $0x2d4] ss:$8 sps:$4 sm:$0xff]  }
  0x1e   :  { %v1642_v43 = vld [vmem:[%s2335_s3 + $0x2e4] ss:$8 sps:$4 sm:$0xff]  }
  0x1f   :  { %901 = vmatpush1.bf16.msra.mxu0 %v1571_v17  ;;  %856 = vmatpush1.bf16.msra.mxu1 %v1677_v47  ;;  %v1619_v17 = vld [vmem:[%s2335_s3 + $0x270] ss:$8 sps:$4 sm:$0xff]   ;;  %v1648_v47 = vld [vmem:[%s2335_s3 + $0x2f4] ss:$8 sps:$4 sm:$0xff]   ;;  %v1728_v11 = vld [vmem:[%s2335_s3 + $0x3c4] ss:$8 sps:$4 sm:$0xff]  }
  0x20   :  { %902 = vmatprep.subr.bf16.mxu0 %v1572_v18  ;;  %857 = vmatprep.subr.bf16.mxu1 %v1681_v49  ;;  %v1624_v18 = vld [vmem:[%s2335_s3 + $0x284] ss:$8 sps:$4 sm:$0xff]  }
  0x21   :  { %v1656_v49 = vld [vmem:[%s2335_s3 + $0x304] ss:$8 sps:$4 sm:$0xff]  }
  0x23   :  { %903 = vmatpush1.bf16.msra.mxu0 %v1574_v19  ;;  %858 = vmatpush1.bf16.msra.mxu1 %v1683_v53  ;;  %v1622_v19 = vld [vmem:[%s2335_s3 + $0x280] ss:$8 sps:$4 sm:$0xff]  }
  0x24   :  { %904 = vmatprep.subr.bf16.mxu0 %v1575_v20  ;;  %859 = vmatprep.subr.bf16.mxu1 %v1687_v54  ;;  %v1725_v20 = vld [vmem:[%s2335_s3 + $0xd0] ss:$8 sps:$4 sm:$0xff]   ;;  %v1662_v54 = vld [vmem:[%s2335_s3 + $0x314] ss:$8 sps:$4 sm:$0xff]  }
  0x27   :  { %905 = vmatpush1.bf16.msra.mxu0 %v1577_v21  ;;  %860 = vmatpush1.bf16.msra.mxu1 %v1689_v57  ;;  %v1627_v21 = vld [vmem:[%s2335_s3 + $0x294] ss:$8 sps:$4 sm:$0xff]  }
  0x28   :  { %906 = vmatprep.subr.bf16.mxu0 %v1578_v22  ;;  %861 = vmatprep.subr.bf16.mxu1 %v1693_v58  ;;  %v1729_v22 = vld [vmem:[%s2335_s3 + $0xe4] ss:$8 sps:$4 sm:$0xff]   ;;  %v1674_v57 = vld [vmem:[%s2335_s3 + $0x334] ss:$8 sps:$4 sm:$0xff]   ;;  %v1672_v58 = vld [vmem:[%s2335_s3 + $0x330] ss:$8 sps:$4 sm:$0xff]  }
  0x2b   :  { %907 = vmatpush1.bf16.msra.mxu0 %v1580_v23  ;;  %862 = vmatpush1.bf16.msra.mxu1 %v1695_v61  ;;  %v1731_v23 = vld [vmem:[%s2335_s3 + $0xe0] ss:$8 sps:$4 sm:$0xff]   ;;  %v1686_v61 = vld [vmem:[%s2335_s3 + $0x354] ss:$8 sps:$4 sm:$0xff]  }
  0x2c   :  { %908 = vmatprep.subr.bf16.mxu0 %v1581_v24  ;;  %863 = vmatprep.subr.bf16.mxu1 %v1699_v62  ;;  %v1735_v24 = vld [vmem:[%s2335_s3 + $0xf4] ss:$8 sps:$4 sm:$0xff]   ;;  %v1684_v62 = vld [vmem:[%s2335_s3 + $0x350] ss:$8 sps:$4 sm:$0xff]  }
  0x2f   :  { %909 = vmatpush1.bf16.msra.mxu0 %v1583_v27  ;;  %864 = vmatpush1.bf16.msra.mxu1 %v1701_v1  ;;  %v1737_v27 = vld [vmem:[%s2335_s3 + $0xf0] ss:$8 sps:$4 sm:$0xff]   ;;  %v1698_v1 = vld [vmem:[%s2335_s3 + $0x374] ss:$8 sps:$4 sm:$0xff]  }
  0x30   :  { %910 = vmatprep.subr.bf16.mxu0 %v1584_v28  ;;  %865 = vmatprep.subr.bf16.mxu1 %v1705_v2  ;;  %v1748_v28 = vld [vmem:[%s2337_s5 + $0x40] sm:$0xff]   ;;  %v1696_v2 = vld [vmem:[%s2335_s3 + $0x370] ss:$8 sps:$4 sm:$0xff]  }
  0x33   :  { %911 = vmatpush1.bf16.msra.mxu0 %v1586_v31  ;;  %866 = vmatpush1.bf16.msra.mxu1 %v1707_v5  ;;  %v1321_v31 = vcombine.low %v33_v9, %v33_v9  ;;  %v1710_v5 = vld [vmem:[%s2335_s3 + $0x394] ss:$8 sps:$4 sm:$0xff]  }
  0x34   :  { %912 = vmatprep.subr.bf16.mxu0 %v1587_v32  ;;  %867 = vmatprep.subr.bf16.mxu1 %v1711_v6  ;;  %v1749_v32 = vld [vmem:[%s2337_s5] sm:$0xff]   ;;  %v1708_v6 = vld [vmem:[%s2335_s3 + $0x390] ss:$8 sps:$4 sm:$0xff]   ;;  %v1722_v9 = vld [vmem:[%s2335_s3 + $0x3b4] ss:$8 sps:$4 sm:$0xff]  }
  0x37   :  { %913 = vmatpush1.bf16.msra.mxu0 %v1589_v36  ;;  %868 = vmatpush1.bf16.msra.mxu1 %v1713_v10  ;;  %v1751_v36 = vld [vmem:[%s2337_s5 + $0x8] sm:$0xff]   ;;  %v1720_v10 = vld [vmem:[%s2335_s3 + $0x3b0] ss:$8 sps:$4 sm:$0xff]  }
  0x38   :  { %914 = vmatprep.subr.bf16.mxu0 %v1590_v37  ;;  %869 = vmatprep.subr.bf16.mxu1 %v1717_v12  ;;  %v1752_v37 = vld [vmem:[%s2337_s5 + $0x50] sm:$0xff]   ;;  %v1726_v12 = vld [vmem:[%s2335_s3 + $0x3c0] ss:$8 sps:$4 sm:$0xff]  }
  0x3b   :  { %915 = vmatpush1.bf16.msra.mxu0 %v1592_v40  ;;  %870 = vmatpush1.bf16.msra.mxu1 %v1719_v15  ;;  %v1753_v40 = vld [vmem:[%s2337_s5 + $0x10] sm:$0xff]   ;;  %v1740_v15 = vld [vmem:[%s2335_s3 + $0x3e4] ss:$8 sps:$4 sm:$0xff]  }
  0x3c   :  { %916 = vmatprep.subr.bf16.mxu0 %v1593_v41  ;;  %871 = vmatprep.subr.bf16.mxu1 %v1723_v16  ;;  %v1754_v41 = vld [vmem:[%s2337_s5 + $0x58] sm:$0xff]   ;;  %v1738_v16 = vld [vmem:[%s2335_s3 + $0x3e0] ss:$8 sps:$4 sm:$0xff]  }
  0x3f   :  { %917 = vmatpush1.bf16.msra.mxu0 %v1595_v44  ;;  %872 = vmatpush1.bf16.msra.mxu1 %v1725_v20  ;;  %v1755_v44 = vld [vmem:[%s2337_s5 + $0x18] sm:$0xff]   ;;  %v1756_v20 = vld [vmem:[%s2337_s5 + $0x60] sm:$0xff]  }
  0x40   :  { %927 = vmatprep.subr.bf16.mxu0 %v1600_v45  ;;  %873 = vmatprep.subr.bf16.mxu1 %v1729_v22  ;;  %v1640_v45 = vld [vmem:[%s2335_s3 + $0x2e0] ss:$8 sps:$4 sm:$0xff]  }
  0x41   :  { %v1758_v22 = vld [vmem:[%s2337_s5 + $0x68] sm:$0xff]  }
  0x42   :  { %919 = vmatmul.mubr.bf16.vlgmr.msra.gmra.mrb[0].mxu0 %v1323_v48  ;;  %v1646_v48 = vld [vmem:[%s2335_s3 + $0x2f0] ss:$8 sps:$4 sm:$0xff]  }
  0x43   :  { %928 = vmatpush1.bf16.msra.mxu0 %v1598_v50  ;;  %959 = vmatprep.mubr.bf16.mxu0 %v1326_v51  ;;  %v2165_v50 = vld [vmem:[%s2336_s0 + $0x18] sm:$0xff]  ;;  %v1325_v51 = vcombine.low %v1970_v46, %v1970_v46  ;;  %v1668_v46 = vld [vmem:[%s2335_s3 + $0x324] ss:$8 sps:$4 sm:$0xff]  }
  0x44   :  { %929 = vmatprep.subr.bf16.mxu0 %v1603_v52  ;;  %874 = vmatpush1.bf16.msra.mxu1 %v1731_v23  ;;  %v1654_v52 = vld [vmem:[%s2335_s3 + $0x300] ss:$8 sps:$4 sm:$0xff]   ;;  %v1328_v53 = vcombine.high %v2165_v50, %v2165_v50 }
  0x45   :  { %875 = vmatprep.subr.bf16.mxu1 %v1735_v24  ;;  %v1759_v23 = vld [vmem:[%s2337_s5 + $0x28] sm:$0xff]   ;;  %v1760_v24 = vld [vmem:[%s2337_s5 + $0x70] sm:$0xff]  }
  0x47   :  { %930 = vmatpush1.bf16.msra.mxu0 %v1601_v55  ;;  %v1660_v55 = vld [vmem:[%s2335_s3 + $0x310] ss:$8 sps:$4 sm:$0xff]  }
  0x48   :  { %931 = vmatprep.subr.bf16.mxu0 %v1606_v56  ;;  %876 = vmatpush1.bf16.msra.mxu1 %v1737_v27  ;;  %v1666_v56 = vld [vmem:[%s2335_s3 + $0x320] ss:$8 sps:$4 sm:$0xff]   ;;  %v1763_v27 = vld [vmem:[%s2337_s5 + $0x38] sm:$0xff]  }
  0x49   :  { %1483 = vmatprep.subr.bf16.mxu1 %v1748_v28  ;;  %v1776_v28 = vmov 0.0  }
  0x4b   :  { %932 = vmatpush1.bf16.msra.mxu0 %v1604_v59  ;;  %878 = vmatmul.mubr.bf16.vlgmr.msra.gmra.mrb[0].mxu1 %v1321_v31  ;;  %v1680_v59 = vld [vmem:[%s2335_s3 + $0x344] ss:$8 sps:$4 sm:$0xff]  }
  0x4c   :  { %933 = vmatprep.subr.bf16.mxu0 %v1609_v60  ;;  %1484 = vmatpush3.bf16.msra.mxu1 %v1749_v32  ;;  %v1678_v60 = vld [vmem:[%s2335_s3 + $0x340] ss:$8 sps:$4 sm:$0xff]  }
  0x4d   :  { %1485 = vmatprep.subr.bf16.mxu1 %v1750_v33  ;;  %v167_v33 = vlaneseq }
  0x4f   :  { %934 = vmatpush1.bf16.msra.mxu0 %v1607_v63  ;;  %v1692_v63 = vld [vmem:[%s2335_s3 + $0x364] ss:$8 sps:$4 sm:$0xff]  }
  0x50   :  { %935 = vmatprep.subr.bf16.mxu0 %v1612_v0  ;;  %1486 = vmatpush3.bf16.msra.mxu1 %v1751_v36  ;;  %v1690_v0 = vld [vmem:[%s2335_s3 + $0x360] ss:$8 sps:$4 sm:$0xff]  }
  0x51   :  { %1487 = vmatprep.subr.bf16.mxu1 %v1752_v37  ;;  %v165_v36 = vld [vmem:[%s2339_s4] sm:$0x3] }
  0x53   :  { %936 = vmatpush1.bf16.msra.mxu0 %v1610_v3  ;;  %v1704_v3 = vld [vmem:[%s2335_s3 + $0x384] ss:$8 sps:$4 sm:$0xff]  }
  0x54   :  { %937 = vmatprep.subr.bf16.mxu0 %v1615_v4  ;;  %1488 = vmatpush3.bf16.msra.mxu1 %v1753_v40  ;;  %v1702_v4 = vld [vmem:[%s2335_s3 + $0x380] ss:$8 sps:$4 sm:$0xff]  }
  0x55   :  { %1489 = vmatprep.subr.bf16.mxu1 %v1754_v41 }
  0x57   :  { %938 = vmatpush1.bf16.msra.mxu0 %v1613_v7  ;;  %v1716_v7 = vld [vmem:[%s2335_s3 + $0x3a4] ss:$8 sps:$4 sm:$0xff]  }
  0x58   :  { %939 = vmatprep.subr.bf16.mxu0 %v1618_v8  ;;  %1490 = vmatpush3.bf16.msra.mxu1 %v1755_v44  ;;  %v1714_v8 = vld [vmem:[%s2335_s3 + $0x3a0] ss:$8 sps:$4 sm:$0xff]  }
  0x59   :  { %1491 = vmatprep.subr.bf16.mxu1 %v1756_v20 }
  0x5b   :  { %940 = vmatpush1.bf16.msra.mxu0 %v1616_v13  ;;  %v1734_v13 = vld [vmem:[%s2335_s3 + $0x3d4] ss:$8 sps:$4 sm:$0xff]  }
  0x5c   :  { %941 = vmatprep.subr.bf16.mxu0 %v1621_v14  ;;  %v1732_v14 = vld [vmem:[%s2335_s3 + $0x3d0] ss:$8 sps:$4 sm:$0xff]  }
  0x5f   :  { %942 = vmatpush1.bf16.msra.mxu0 %v1619_v17  ;;  %v1745_v17 = vld [vmem:[%s2335_s3 + $0x3f4] ss:$8 sps:$4 sm:$0xff]  }
  0x60   :  { %943 = vmatprep.subr.bf16.mxu0 %v1624_v18  ;;  %v1743_v18 = vld [vmem:[%s2335_s3 + $0x3f0] ss:$8 sps:$4 sm:$0xff]  }
  0x63   :  { %944 = vmatpush1.bf16.msra.mxu0 %v1622_v19  ;;  %v1327_v19 = vcombine.low %v2165_v50, %v2165_v50  ;;  %v1012_v50 = vld [vmem:[%s2340_s1 + $0x8] sm:$0xff] }
  0x64   :  { %945 = vmatprep.subr.bf16.mxu0 %v1627_v21  ;;  %v1757_v21 = vld [vmem:[%s2337_s5 + $0x20] sm:$0xff]  }
  0x65   :  { %1492 = vmatpush3.bf16.msra.mxu1 %v1757_v21 }
  0x66   :  { %1493 = vmatprep.subr.bf16.mxu1 %v1758_v22 }
  0x67   :  { %946 = vmatpush1.bf16.msra.mxu0 %v1625_v25  ;;  %v1761_v25 = vld [vmem:[%s2337_s5 + $0x30] sm:$0xff]  }
  0x68   :  { %947 = vmatprep.subr.bf16.mxu0 %v1630_v26  ;;  %v1762_v26 = vld [vmem:[%s2337_s5 + $0x78] sm:$0xff]  }
  0x69   :  { %1494 = vmatpush3.bf16.msra.mxu1 %v1759_v23 }
  0x6a   :  { %1495 = vmatprep.subr.bf16.mxu1 %v1760_v24 }
  0x6b   :  { %948 = vmatpush1.bf16.msra.mxu0 %v1628_v29 }
  0x6c   :  { %949 = vmatprep.subr.bf16.mxu0 %v1633_v30 }
  0x6d   :  { %1496 = vmatpush3.bf16.msra.mxu1 %v1761_v25 }
  0x6e   :  { %1497 = vmatprep.subr.bf16.mxu1 %v1762_v26 }
  0x6f   :  { %950 = vmatpush1.bf16.msra.mxu0 %v1631_v34  ;;  %v168_v34 = vshrl.u32 %v167_v33, 7 }
  0x70   :  { %951 = vmatprep.subr.bf16.mxu0 %v1636_v35 }
  0x71   :  { %1498 = vmatpush3.bf16.msra.mxu1 %v1763_v27  ;;  %v169_v35 = vsub.s32 0, %v168_v34  ;;  %v173_v37 = vsub.s32 1, %v168_v34 }
  0x72   :  { %1514 = vmatprep.subr.bf16.mxu1 %v1776_v28 }
  0x73   :  { %952 = vmatpush1.bf16.msra.mxu0 %v1634_v38  ;;  %v170_v38 = vrot.slane %v165_v36, %v169_v35 }
  0x74   :  { %953 = vmatprep.subr.bf16.mxu0 %v1639_v39  ;;  %v174_v39 = vrot.slane %v165_v36, %v173_v37 }
  0x77   :  { %954 = vmatpush1.bf16.msra.mxu0 %v1637_v42 }
  0x78   :  { %955 = vmatprep.subr.bf16.mxu0 %v1642_v43 }
  0x7b   :  { %956 = vmatpush1.bf16.msra.mxu0 %v1640_v45  ;;  %v1011_v45 = vld [vmem:[%s2340_s1] sm:$0xff] }
  0x7c   :  { %957 = vmatprep.subr.bf16.mxu0 %v1648_v47 }
  0x7f   :  { %958 = vmatpush1.bf16.msra.mxu0 %v1646_v48 }
  0x80   :  { %968 = vmatprep.subr.bf16.mxu0 %v1656_v49 }
  0x82   :  { %960 = vmatmul.mubr.bf16.vlgmr.msra.gmra.mrb[0].mxu0 %v1325_v51 }
  0x83   :  { %969 = vmatpush1.bf16.msra.mxu0 %v1654_v52  ;;  %1000 = vmatprep.mubr.bf16.mxu0 %v1328_v53 }
  0x84   :  { %970 = vmatprep.subr.bf16.mxu0 %v1662_v54 }
  0x87   :  { %971 = vmatpush1.bf16.msra.mxu0 %v1660_v55 }
  0x88   :  { %972 = vmatprep.subr.bf16.mxu0 %v1668_v46  ;;  %v1764_v46 = vld [vmem:[%s2338_s7] sm:$0xff]  }
  0x8b   :  { %973 = vmatpush1.bf16.msra.mxu0 %v1666_v56 }
  0x8c   :  { %974 = vmatprep.subr.bf16.mxu0 %v1674_v57  ;;  %v1765_v57 = vld [vmem:[%s2338_s7 + $0x8] sm:$0xff]  }
  0x8f   :  { %975 = vmatpush1.bf16.msra.mxu0 %v1672_v58  ;;  %v1766_v58 = vld [vmem:[%s2338_s7 + $0x10] sm:$0xff]  }
  0x90   :  { %976 = vmatprep.subr.bf16.mxu0 %v1680_v59  ;;  %v1767_v59 = vld [vmem:[%s2338_s7 + $0x18] sm:$0xff]  }
  0x93   :  { %977 = vmatpush1.bf16.msra.mxu0 %v1678_v60  ;;  %v1768_v60 = vld [vmem:[%s2338_s7 + $0x20] sm:$0xff]  }
  0x94   :  { %978 = vmatprep.subr.bf16.mxu0 %v1686_v61  ;;  %v1769_v61 = vld [vmem:[%s2338_s7 + $0x28] sm:$0xff]  }
  0x97   :  { %979 = vmatpush1.bf16.msra.mxu0 %v1684_v62  ;;  %v1770_v62 = vld [vmem:[%s2338_s7 + $0x30] sm:$0xff]  }
  0x98   :  { %980 = vmatprep.subr.bf16.mxu0 %v1692_v63  ;;  %v1771_v63 = vld [vmem:[%s2338_s7 + $0x38] sm:$0xff]  }
  0x9b   :  { %981 = vmatpush1.bf16.msra.mxu0 %v1690_v0 }
  0x9c   :  { %982 = vmatprep.subr.bf16.mxu0 %v1698_v1  ;;  %v1457_v1 = vld [vmem:[%s2341_s6] ss:$0 sm:$0xff] }
  0x9f   :  { %983 = vmatpush1.bf16.msra.mxu0 %v1696_v2 }
  0xa0   :  { %984 = vmatprep.subr.bf16.mxu0 %v1704_v3 }
  0xa3   :  { %985 = vmatpush1.bf16.msra.mxu0 %v1702_v4 }
  0xa4   :  { %986 = vmatprep.subr.bf16.mxu0 %v1710_v5 }
  0xa7   :  { %987 = vmatpush1.bf16.msra.mxu0 %v1708_v6 }
  0xa8   :  { %988 = vmatprep.subr.bf16.mxu0 %v1716_v7  ;;  %v1193_v7 = vld [vmem:[%s2342_s2] sm:$0xff] }
  0xab   :  { %989 = vmatpush1.bf16.msra.mxu0 %v1714_v8 }
  0xac   :  { %990 = vmatprep.subr.bf16.mxu0 %v1722_v9 }
  0xaf   :  { %991 = vmatpush1.bf16.msra.mxu0 %v1720_v10 }
  0xb0   :  { %992 = vmatprep.subr.bf16.mxu0 %v1728_v11  ;;  %v1474_v11 = vld [vmem:[%s2343_s8] ss:$0 sm:$0xff] }
  0xb3   :  { %993 = vmatpush1.bf16.msra.mxu0 %v1726_v12 }
  0xb4   :  { %994 = vmatprep.subr.bf16.mxu0 %v1734_v13 }
  0xb7   :  { %995 = vmatpush1.bf16.msra.mxu0 %v1732_v14 }
  0xb8   :  { %996 = vmatprep.subr.bf16.mxu0 %v1740_v15 }
  0xbb   :  { %997 = vmatpush1.bf16.msra.mxu0 %v1738_v16 }
  0xbc   :  { %998 = vmatprep.subr.bf16.mxu0 %v1745_v17 }
  0xbf   :  { %999 = vmatpush1.bf16.msra.mxu0 %v1743_v18 }
  0xc2   :  { %1001 = vmatmul.mubr.bf16.vlgmr.msra.gmra.mrb[0].mxu0 %v1327_v19 }
 0x11e   :  { %v879_v29 = vpop.f32.mrb[0].mxu1 }
 0x11f   :  { %v881_v30 = vpop.f32.mrb[1].mxu1  ;;  %v880_v40 = vadd.f32 %v879_v29, %v170_v38 }
 0x120   :  { %v883_v31 = vpop.f32.mrb[2].mxu1  ;;  %v882_v41 = vadd.f32 %v881_v30, %v174_v39 }
 0x121   :  { %v884_v32 = vpop.f32.mrb[3].mxu1 }
 0x195   :  { %v1002_v42 = vpop.f32.mrb[0].mxu0 }
 0x196   :  { %v1535_v43 = vadd.f32 %v1002_v42, %v880_v40  ;;  %v1004_v44 = vpop.f32.mrb[1].mxu0 }
 0x197   :  { %v1537_v47 = vadd.f32 %v1004_v44, %v882_v41  ;;  %v1006_v48 = vpop.f32.mrb[2].mxu0 }
 0x198   :  { %v1009_v49 = vmax.f32 %v1535_v43, 0.0  ;;  %v1007_v51 = vpop.f32.mrb[3].mxu0 }
 0x199   :  { %v1010_v52 = vmax.f32 %v1537_v47, 0.0 }
 0x19a   :  { %v1013_v53 = vmul.f32 %v1011_v45, %v1009_v49 }
 0x19b   :  { %v1014_v54 = vmul.f32 %v1012_v50, %v1010_v52 }
 0x19c   :  { %v1015_v56 = vpack.c.bf16 %v1013_v53, %v1013_v53 }
 0x19d   :  { %v1016_v55 = vpack.c.bf16 %v1014_v54, %v1014_v54 }
 0x19f   :  { %1184 = vmatprep.mubr.bf16.mxu1 %v1016_v55 }
 0x1a0   :  { %1185 = vmatmul.mubr.bf16.vlgmr.msra.gmra.mrb[4].mxu1 %v1015_v56 }
 0x1a1   :  { %1515 = vmatpush3.bf16.msra.mxu1 %v1764_v46  ;;  %1530 = vmatprep.mubr.msk.bf16.mxu1 %vm1777_vm0, %v1776_v28 }
 0x1a2   :  { %1516 = vmatprep.subr.bf16.mxu1 %v1776_v28 }
 0x1a5   :  { %1517 = vmatpush3.bf16.msra.mxu1 %v1765_v57 }
 0x1a6   :  { %1518 = vmatprep.subr.bf16.mxu1 %v1776_v28 }
 0x1a9   :  { %1519 = vmatpush3.bf16.msra.mxu1 %v1766_v58 }
 0x1aa   :  { %1520 = vmatprep.subr.bf16.mxu1 %v1776_v28 }
 0x1ad   :  { %1521 = vmatpush3.bf16.msra.mxu1 %v1767_v59 }
 0x1ae   :  { %1522 = vmatprep.subr.bf16.mxu1 %v1776_v28 }
 0x1b1   :  { %1523 = vmatpush3.bf16.msra.mxu1 %v1768_v60 }
 0x1b2   :  { %1524 = vmatprep.subr.bf16.mxu1 %v1776_v28 }
 0x1b5   :  { %1525 = vmatpush3.bf16.msra.mxu1 %v1769_v61 }
 0x1b6   :  { %1526 = vmatprep.subr.bf16.mxu1 %v1776_v28 }
 0x1b9   :  { %1527 = vmatpush3.bf16.msra.mxu1 %v1770_v62 }
 0x1ba   :  { %1528 = vmatprep.subr.bf16.mxu1 %v1776_v28 }
 0x1bd   :  { %1529 = vmatpush3.bf16.msra.mxu1 %v1771_v63 }
 0x273   :  { %v1499_v0 = vpop.f32.mrb[4].mxu1 }
 0x274   :  { %v1500_v2 = vpop.f32.mrb[5].mxu1 }
 0x275   :  { %v1501_v3 = vadd.f32 %v1500_v2, %v1499_v0  ;;  %v1502_v4 = vpop.f32.mrb[6].mxu1 }
 0x276   :  { %v1503_v5 = vpop.f32.mrb[7].mxu1 }
 0x277   :  { %v1187_v6 = vadd.f32 %v1501_v3, %v1457_v1 }
 0x279   :  { %v1192_v8 = vmax.f32 %v1187_v6, 0.0 }
 0x27b   :  { %v1194_v9 = vmul.f32 %v1193_v7, %v1192_v8 }
 0x27d   :  { %v1195_v10 = vpack.c.bf16 %v1194_v9, %v1194_v9 }
 0x27f   :  { %1531 = vmatmul.mubr.bf16.vlgmr.msra.gmra.mrb[8].mxu1 %v1195_v10 }
 0x352   :  { %v1301_v12 = vpop.f32.mrb[8].mxu1 }
 0x353   :  { %v1302_v13 = vadd.f32 %v1474_v11, %v1301_v12  ;;  %v1532_v14 = vpop.f32.mrb[9].mxu1 }
 0x354   :  { %v1304_v15 = vpop.f32.mrb[10].mxu1 }
 0x355   :  { %1307 = vmax.xlane.f32.xlu0 %v1302_v13  ;;  %v1533_v16 = vpop.f32.mrb[11].mxu1 }
 0x3e2   :  { %v1308_v17 = vpop.xlane.xlu0 %1307 }
 0x3e3   :  { %v1309_v18 = vsub.f32 %v1302_v13, %v1308_v17 }
 0x3e5   :  { %v1310_v19 = vmul.f32 1.442695, %v1309_v18 }
 0x3e7   :  { %1772 = vpow2.f32 %v1310_v19 }
 0x3f1   :  { %v1773_v20 = vpop.eup %1772 }
 0x3f2   :  { %1312 = vadd.xlane.f32.xlu0 %v1773_v20 }
 0x47f   :  { %v1313_v21 = vpop.xlane.xlu0 %1312 }
 0x480   :  { %1774 = vrcp.f32 %v1313_v21 }
 0x48a   :  { %v1775_v22 = vpop.eup %1774 }
 0x48b   :  { %v1315_v23 = vmul.f32 %v1775_v22, %v1773_v20 }
 0x48d   :  { %1316 = vst [vmem:[%s2344_s9] sm:$0xff] %v1315_v23 }

</bundles_post_ra>
